<compile_context>
chip_gen: v7x
topology: tpu7x:2x2x1
jax: 0.10.0
libtpu: 0.0.40
codegen_flags: <defaults>
</compile_context>

<pallas_src>
import math

import jax
import jax.numpy as jnp
from jax.experimental import pallas as pl
from jax.experimental.pallas import tpu as pltpu

_LANES = 1024       # lane-dense last dim (multiple of 128)
_TILE_ROWS = 512    # 512x1024 f32 = 2 MiB tile; safe on v5e/v6e/v7x scoped VMEM


def _blend_kernel(gate_ref, f1_ref, f2_ref, o_ref):
    # gate_ref: scalar-prefetched (1,) f32 in SMEM holding l = sigmoid(lamb).
    l = gate_ref[0]
    dt = f1_ref.dtype
    # Blend in the feature dtype (keeps bf16 tiles in bf16; f32 is unchanged).
    w1 = l.astype(dt)
    w2 = (1.0 - l).astype(dt)
    o_ref[...] = w1 * f1_ref[...] + w2 * f2_ref[...]


def _blend_call(gate, f1_flat, f2_flat):
    """Run the tiled blend over a flat 1-D slab; returns flat result."""
    assert f1_flat.shape == f2_flat.shape and f1_flat.dtype == f2_flat.dtype
    total = f1_flat.shape[0]
    dtype = f1_flat.dtype

    rows = max(1, -(-total // _LANES))
    padded = rows * _LANES
    if padded != total:
        pad = padded - total
        f1_flat = jnp.pad(f1_flat, (0, pad))
        f2_flat = jnp.pad(f2_flat, (0, pad))
    f1_2d = f1_flat.reshape(rows, _LANES)
    f2_2d = f2_flat.reshape(rows, _LANES)

    # Block rows: either a multiple of 8 (512) or the full row extent.
    tile_r = _TILE_ROWS if rows >= _TILE_ROWS else rows
    n_tiles = -(-rows // tile_r)

    gate_arr = jnp.asarray(gate, dtype=jnp.float32).reshape(1)

    out = pl.pallas_call(
        _blend_kernel,
        out_shape=jax.ShapeDtypeStruct((rows, _LANES), dtype),
        grid_spec=pltpu.PrefetchScalarGridSpec(
            num_scalar_prefetch=1,
            grid=(n_tiles,),
            in_specs=[
                pl.BlockSpec((tile_r, _LANES), lambda i, g: (i, 0)),
                pl.BlockSpec((tile_r, _LANES), lambda i, g: (i, 0)),
            ],
            out_specs=pl.BlockSpec((tile_r, _LANES), lambda i, g: (i, 0)),
        ),
        compiler_params=pltpu.CompilerParams(
            dimension_semantics=("parallel",),
        ),
    )(gate_arr, f1_2d, f2_2d)

    return out.reshape(-1)[:total]


def lambda_sum_fused(gate, features1, features2):
    """Fuse all layer pairs with one pallas_call; returns list of outputs."""
    assert len(features1) == len(features2)
    if not features1:
        return []
    dtype = features1[0].dtype
    for f1, f2 in zip(features1, features2):
        assert f1.shape == f2.shape and f1.dtype == dtype and f2.dtype == dtype

    shapes = [f.shape for f in features1]
    sizes = [math.prod(s) for s in shapes]
    f1_flat = jnp.concatenate([f.reshape(-1) for f in features1])
    f2_flat = jnp.concatenate([f.reshape(-1) for f in features2])

    out_flat = _blend_call(gate, f1_flat, f2_flat)

    outs = []
    off = 0
    for s, n in zip(shapes, sizes):
        outs.append(out_flat[off:off + n].reshape(s))
        off += n
    return outs


class LambdaSum:
    """JAX/Pallas port of s3prl lambda_sum fusioner (synthetic params)."""

    def __init__(self, upstream_dim, init_lamb=0.0, fix_lamb=False):
        self.upstream_dim = upstream_dim
        self.fix_lamb = fix_lamb
        if fix_lamb:
            # Pre-baked fixed gate in [0, 1] (not trainable).
            self.l = jax.nn.sigmoid(jnp.float32(init_lamb))
            self.lamb = None
        else:
            # Trainable scalar logit parameter (deterministic init).
            self.lamb = jnp.float32(init_lamb)
            self.l = None

    def __call__(self, features1, features2):
        # Gate computed once (scalar); no logit round-trip for fix_lamb.
        gate = self.l if self.fix_lamb else jax.nn.sigmoid(self.lamb)
        return lambda_sum_fused(gate, features1, features2)


if __name__ == "__main__":
    key = jax.random.PRNGKey(0)
    batch, seq, dim = 2, 8, 32

    k1, k2, k3, k4 = jax.random.split(key, 4)
    # Two "layers" of features from each upstream, as in s3prl (list of tensors).
    features1 = [
        jax.random.normal(k1, (batch, seq, dim), dtype=jnp.float32),
        jax.random.normal(k2, (batch, seq, dim), dtype=jnp.float32),
    ]
    features2 = [
        jax.random.normal(k3, (batch, seq, dim), dtype=jnp.float32),
        jax.random.normal(k4, (batch, seq, dim), dtype=jnp.float32),
    ]

    # Trainable-gate branch.
    fusioner = LambdaSum(upstream_dim=dim, init_lamb=0.3, fix_lamb=False)
    outs = fusioner(features1, features2)
    outs = [jax.block_until_ready(o) for o in outs]

    l = jax.nn.sigmoid(jnp.float32(0.3))
    for o, f1, f2 in zip(outs, features1, features2):
        ref = l * f1 + (1.0 - l) * f2
        assert jnp.allclose(o, ref, atol=1e-5, rtol=1e-5)

    # Fixed-gate branch.
    fusioner_fix = LambdaSum(upstream_dim=dim, init_lamb=-0.7, fix_lamb=True)
    outs_fix = fusioner_fix(features1, features2)
    outs_fix = [jax.block_until_ready(o) for o in outs_fix]

    lf = jax.nn.sigmoid(jnp.float32(-0.7))
    for o, f1, f2 in zip(outs_fix, features1, features2):
        ref = lf * f1 + (1.0 - lf) * f2
        assert jnp.allclose(o, ref, atol=1e-5, rtol=1e-5)

    print("KERNEL_OK")
</pallas_src>

<mosaic_0001>
module attributes {stable_mosaic.version = 11 : i64} {
  func.func @_blend_kernel(%arg0: i32, %arg1: memref<1xf32, #tpu.memory_space<smem>>, %arg2: memref<1x1024xf32, #tpu.memory_space<vmem>>, %arg3: memref<1x1024xf32, #tpu.memory_space<vmem>>, %arg4: memref<1x1024xf32, #tpu.memory_space<vmem>>) attributes {dimension_semantics = [#tpu.dimension_semantics<parallel>], iteration_bounds = array<i64: 1>, scalar_prefetch = 1 : i64, scratch_operands = 0 : i64, tpu.core_type = #tpu.core_type<tc>, window_params = [{transform_indices = @transform_0, window_bounds = array<i64: 1, 1024>}, {transform_indices = @transform_1, window_bounds = array<i64: 1, 1024>}, {transform_indices = @transform_2, window_bounds = array<i64: 1, 1024>}]} {
    %c0 = arith.constant 0 : index
    %0 = memref.load %arg1[%c0] : memref<1xf32, #tpu.memory_space<smem>>
    %cst = arith.constant 1.000000e+00 : f32
    %1 = arith.subf %cst, %0 : f32
    %c0_0 = arith.constant 0 : index
    %c0_1 = arith.constant 0 : index
    %2 = vector.load %arg2[%c0_0, %c0_1] : memref<1x1024xf32, #tpu.memory_space<vmem>>, vector<1x1024xf32>
    %3 = vector.broadcast %0 : f32 to vector<1x1024xf32>
    %4 = arith.mulf %3, %2 : vector<1x1024xf32>
    %c0_2 = arith.constant 0 : index
    %c0_3 = arith.constant 0 : index
    %5 = vector.load %arg3[%c0_2, %c0_3] : memref<1x1024xf32, #tpu.memory_space<vmem>>, vector<1x1024xf32>
    %6 = vector.broadcast %1 : f32 to vector<1x1024xf32>
    %7 = arith.mulf %6, %5 : vector<1x1024xf32>
    %8 = arith.addf %4, %7 : vector<1x1024xf32>
    %c0_4 = arith.constant 0 : index
    %c0_5 = arith.constant 0 : index
    %9 = vector.load %arg4[%c0_4, %c0_5] : memref<1x1024xf32, #tpu.memory_space<vmem>>, vector<1x1024xf32>
    tpu.vector_store %arg4[%c0_4, %c0_5], %8 {strides = array<i32>} : memref<1x1024xf32, #tpu.memory_space<vmem>>, vector<1x1024xf32>,
    return
  }
  func.func @transform_0(%arg0: i32, %arg1: memref<1xf32, #tpu.memory_space<smem>>) -> (i32, i32) {
    %c0_i32 = arith.constant 0 : i32
    %c0_i32_0 = arith.constant 0 : i32
    return %arg0, %c0_i32 : i32, i32
  }
  func.func @transform_1(%arg0: i32, %arg1: memref<1xf32, #tpu.memory_space<smem>>) -> (i32, i32) {
    %c0_i32 = arith.constant 0 : i32
    %c0_i32_0 = arith.constant 0 : i32
    return %arg0, %c0_i32 : i32, i32
  }
  func.func @transform_2(%arg0: i32, %arg1: memref<1xf32, #tpu.memory_space<smem>>) -> (i32, i32) {
    %c0_i32 = arith.constant 0 : i32
    %c0_i32_0 = arith.constant 0 : i32
    return %arg0, %c0_i32 : i32, i32
  }
}

</mosaic_0001>

<bundles_post_ra>
// kernel: tpu_custom_call.1
= control target key start
LH: loop header
LB: loop body
LE: loop exit
PB: predicated region body
PF: predicated region fallthrough
CT: control target
= control target key end

     0   :  { %9 = vsyncpa [#allocation5], 0  ;;  %s204_s0 = inlined_call_operand.<no memory space> [shape: f32[1], index: 0, kind: input, shape index: {}]   ;;  %s205_s1 = inlined_call_operand.hbm [shape: f32[1,1024], index: 1, kind: input, shape index: {}]   ;;  %s206_s2 = inlined_call_operand.hbm [shape: f32[1,1024], index: 2, kind: input, shape index: {}]   ;;  %s207_s3 = inlined_call_operand.hbm [shape: f32[1,1024], index: 3, kind: output, shape index: {}]  }
   0x1   :  { %10 = vsyncpa [#allocation8], 0 }
   0x2   :  { %11 = vsyncpa [#allocation6], 0  ;;  %s139_s12 = smov [#allocation4]   ;;  %s140_s14 = smov [#allocation7]  }
   0x3   :  { %s18_s13 = sshll.u32 %s139_s12, 4  ;;  %s28_s15 = sshll.u32 %s140_s14, 4  ;;  %s19_s13 = int_to_ptr.vmem [resolvable:$true] %s18_s13  ;;  %s29_s15 = int_to_ptr.vmem [resolvable:$true] %s28_s15 }
   0x4   :  { %s67_s18 = scalar_lea.hbm %s205_s1, 128 }
   0x5   :  { %p68_p0 = scmp.ne.s32.totalorder %s205_s1, %s67_s18  ;;  %p71_p1 = scmp.lt.u32.totalorder %s67_s18, %s205_s1 }
   0x7   :  { %p73_p2 = pnand %p71_p1, %p68_p0 }
   0x9   :  { %76 = shalt.err (!%p73_p2)
}
   0xa   :  { %s77_s23 = scalar_lea.vmem %s19_s13, 128  ;;  %p82_p4 = scmp.lt.s32.totalorder %s19_s13, %s19_s13 }
   0xb   :  { %p78_p3 = scmp.ne.s32.totalorder %s19_s13, %s77_s23  ;;  %p83_p5 = scmp.lt.s32.totalorder %s77_s23, %s77_s23 }
   0xd   :  { %p84_p6 = por %p83_p5, %p82_p4 }
   0xf   :  { %p85_p7 = pnand %p84_p6, %p78_p3 }
  0x11   :  { %88 = shalt.err (!%p85_p7)
}
  0x12   :  { %21 = dma.hbm_to_vmem [thread:$0]  %s205_s1, 128, %s19_s13, [#allocation5]  }
  0x13   :  { %s89_s28 = scalar_lea.hbm %s206_s2, 128 }
  0x14   :  { %p90_p8 = scmp.ne.s32.totalorder %s206_s2, %s89_s28  ;;  %p93_p9 = scmp.lt.u32.totalorder %s89_s28, %s206_s2 }
  0x16   :  { %p95_p10 = pnand %p93_p9, %p90_p8 }
  0x18   :  { %98 = shalt.err (!%p95_p10)
}
  0x19   :  { %s99_s6 = scalar_lea.vmem %s29_s15, 128  ;;  %p104_p12 = scmp.lt.s32.totalorder %s29_s15, %s29_s15 }
  0x1a   :  { %p100_p11 = scmp.ne.s32.totalorder %s29_s15, %s99_s6  ;;  %p105_p13 = scmp.lt.s32.totalorder %s99_s6, %s99_s6 }
  0x1c   :  { %p106_p0 = por %p105_p13, %p104_p12 }
  0x1e   :  { %p107_p1 = pnand %p106_p0, %p100_p11 }
  0x20   :  { %110 = shalt.err (!%p107_p1)
}
  0x21   :  { %31 = dma.hbm_to_vmem [thread:$0]  %s206_s2, 128, %s29_s15, [#allocation8]  }
  0x22   :  { %133 = dma.done.wait [#allocation5], 128  }
  0x23   :  { %134 = vsyncadd [#allocation5], 4294967168 }
  0x24   :  { %135 = dma.done.wait [#allocation8], 128  }
  0x25   :  { %136 = vsyncadd [#allocation8], 4294967168  ;;  %s39_s10 = ssub.f32 1.0, %s204_s0  ;;  %v41_v0 = vstv %s204_s0  ;;  %v40_v2 = vld [vmem:[#allocation4] sm:$0xff]  ;;  %v43_v3 = vld [vmem:[#allocation7] sm:$0xff]  ;;  %s141_s13 = smov [#allocation9]  }
  0x26   :  { %s54_s14 = sshll.u32 %s141_s13, 4  ;;  %v42_v4 = vmul.f32 %v41_v0, %v40_v2  ;;  %s55_s14 = int_to_ptr.vmem [resolvable:$true] %s54_s14 }
  0x27   :  { %v44_v1 = vstv %s39_s10  ;;  %s111_s2 = scalar_lea.vmem %s55_s14, 128  ;;  %p116_p3 = scmp.lt.s32.totalorder %s55_s14, %s55_s14 }
  0x28   :  { %v45_v5 = vmul.f32 %v44_v1, %v43_v3  ;;  %p112_p2 = scmp.ne.s32.totalorder %s55_s14, %s111_s2  ;;  %p117_p4 = scmp.lt.s32.totalorder %s111_s2, %s111_s2 }
  0x2a   :  { %v46_v6 = vadd.f32 %v45_v5, %v42_v4  ;;  %p118_p5 = por %p117_p4, %p116_p3 }
  0x2c   :  { %47 = vst [vmem:[#allocation9] sm:$0xff] %v46_v6  ;;  %p119_p6 = pnand %p118_p5, %p112_p2 }
  0x2e   :  { %122 = shalt.err (!%p119_p6)
}
  0x2f   :  { %s123_s0 = scalar_lea.hbm %s207_s3, 128 }
  0x30   :  { %p124_p7 = scmp.ne.s32.totalorder %s207_s3, %s123_s0  ;;  %p127_p8 = scmp.lt.u32.totalorder %s123_s0, %s207_s3 }
  0x32   :  { %p129_p9 = pnand %p127_p8, %p124_p7 }
  0x34   :  { %132 = shalt.err (!%p129_p9)
}
  0x35   :  { %57 = dma.vmem_to_hbm [thread:$0]  %s55_s14, 128, %s207_s3, [#allocation6]  }
  0x36   :  { %137 = dma.done.wait [#allocation6], 128  }
  0x37   :  { %138 = vsyncadd [#allocation6], 4294967168 }
  0x38   :  { %61 = vsyncpa [#allocation5], 1 }
  0x39   :  { %62 = vsyncpa [#allocation8], 1 }
  0x3a   :  { %63 = vsyncpa [#allocation6], 1 }

</bundles_post_ra>
